<compile_context>
chip_gen: v7x
topology: tpu7x:2x2x1
jax: 0.10.0
libtpu: 0.0.40
codegen_flags: <defaults>
</compile_context>

<pallas_src>
import math
from functools import partial

import jax
import jax.numpy as jnp
from jax.experimental import pallas as pl
from jax.experimental.pallas import tpu as pltpu

NEG_INF = float("-inf")


def _attn_kernel(*refs, scale, has_values, has_mask):
    idx = 0
    q_ref = refs[idx]; idx += 1
    k_ref = refs[idx]; idx += 1
    if has_values:
        v_ref = refs[idx]; idx += 1
    else:
        v_ref = k_ref                       # values default to keys: no duplicate K DMA
    if has_mask:
        m_ref = refs[idx]; idx += 1
    else:
        m_ref = None
    o_ref = refs[idx]
    p_ref = refs[idx + 1]

    # Fold 1/sqrt(H) into Q (cheaper than scaling the (T,S) scores) and feed the
    # native dtype straight to the MXU with f32 accumulation.
    q = q_ref[...]                          # (bB, tT, H)
    if scale != 1.0:
        q = q * jnp.asarray(scale, dtype=q.dtype)
    k = k_ref[...]                          # (bB, S, H)

    # scores = Q @ K^T, batched over the packed-batch block dim.
    scores = jnp.einsum("bth,bsh->bts", q, k,
                        preferred_element_type=jnp.float32)   # (bB, tT, S) f32

    if m_ref is not None:
        # masked_fill(mask == 0, -inf); mask block is (bB, 1, S), broadcast over T.
        scores = jnp.where(m_ref[...] == 0, NEG_INF, scores)

    # softmax over the source axis (f32).
    # NOTE: fully-masked rows give NaN, same as torch softmax over all -inf.
    mx = jnp.max(scores, axis=-1, keepdims=True)
    e = jnp.exp(scores - mx)
    denom = jnp.sum(e, axis=-1, keepdims=True)
    # exact reciprocal on the (bB,tT,1) denom + multiply (keeps p_attn at f32 precision)
    p = e * pl.reciprocal(denom, approx=False)

    v = v_ref[...]
    o = jnp.einsum("bts,bsh->bth", p.astype(v.dtype), v,
                   preferred_element_type=jnp.float32)        # (bB, tT, H)

    o_ref[...] = o.astype(o_ref.dtype)
    p_ref[...] = p.astype(p_ref.dtype)


def _pick_t_tile(T):
    # Keep T resident when small; otherwise tile it (8-aligned) so the (T,S)
    # scores tile stays within VMEM even on v7x (64 MiB / TC).
    if T <= 512:
        return T
    for cand in (512, 256, 128, 64, 32, 16, 8):
        if T % cand == 0:
            return cand
    return T


def _pick_block_b(B, t_tile, S, H, itemsize):
    # Pack several small per-batch problems per grid step (amortize the
    # ~0.35us per-step overhead and widen the stored output slab).
    per = itemsize * (t_tile * H + 2 * S * H) + 4 * (2 * t_tile * S + t_tile * H)
    budget = 4 << 20
    best = 1
    for bb in range(1, B + 1):
        if B % bb == 0 and per * bb <= budget:
            best = bb
    return best


def discrete_attention(query, keys, values=None, mask=None, *, scaled=True):
    """Pallas port of DiscreteAttention.forward (softmax, dropout=0)."""
    B, T, H = query.shape
    S = keys.shape[1]
    out_dtype = query.dtype

    has_values = values is not None
    has_mask = mask is not None
    scale = (1.0 / math.sqrt(H)) if scaled else 1.0

    t_tile = _pick_t_tile(T)
    itemsize = jnp.dtype(query.dtype).itemsize
    block_b = _pick_block_b(B, t_tile, S, H, itemsize)
    grid = (B // block_b, pl.cdiv(T, t_tile))

    in_specs = [
        pl.BlockSpec((block_b, t_tile, H), lambda b, t: (b, t, 0)),   # Q: tiled by T
        pl.BlockSpec((block_b, S, H), lambda b, t: (b, 0, 0)),        # K: resident across T tiles
    ]
    operands = [query, keys]
    if has_values:
        in_specs.append(pl.BlockSpec((block_b, S, H), lambda b, t: (b, 0, 0)))
        operands.append(values)
    if has_mask:
        mask3 = mask.reshape(B, 1, S).astype(jnp.int32)
        in_specs.append(pl.BlockSpec((block_b, 1, S), lambda b, t: (b, 0, 0)))
        operands.append(mask3)

    out_specs = [
        pl.BlockSpec((block_b, t_tile, H), lambda b, t: (b, t, 0)),
        pl.BlockSpec((block_b, t_tile, S), lambda b, t: (b, t, 0)),
    ]
    out_shape = (
        jax.ShapeDtypeStruct((B, T, H), out_dtype),
        jax.ShapeDtypeStruct((B, T, S), out_dtype),
    )

    # Raise the scoped-VMEM limit only when the per-step blocks actually need it.
    blk_bytes = block_b * (
        t_tile * H * itemsize
        + (2 if has_values else 1) * S * H * itemsize
        + S * 4
        + t_tile * H * itemsize
        + t_tile * S * itemsize
    )
    cp_kwargs = dict(dimension_semantics=("parallel", "parallel"))
    if 3 * blk_bytes > (24 << 20):
        cp_kwargs["vmem_limit_bytes"] = int(min(3 * blk_bytes + (8 << 20), 100 << 20))

    kernel = partial(_attn_kernel, scale=scale,
                     has_values=has_values, has_mask=has_mask)

    o_attn, p_attn = pl.pallas_call(
        kernel,
        out_shape=out_shape,
        grid_spec=pltpu.PrefetchScalarGridSpec(
            num_scalar_prefetch=0,
            grid=grid,
            in_specs=in_specs,
            out_specs=out_specs,
        ),
        compiler_params=pltpu.CompilerParams(**cp_kwargs),
    )(*operands)
    return o_attn, p_attn


def _reference(query, keys, values, mask, *, scaled=True):
    scale = (1.0 / math.sqrt(query.shape[-1])) if scaled else 1.0
    scores = jnp.einsum("bth,bsh->bts", query, keys) * scale
    if mask is not None:
        scores = jnp.where(mask[:, None, :] == 0, NEG_INF, scores)
    p = jax.nn.softmax(scores, axis=-1)
    o = jnp.einsum("bts,bsh->bth", p, values)
    return o, p


if __name__ == "__main__":
    B, T, S, H = 2, 8, 8, 32

    key = jax.random.PRNGKey(0)
    kq, kk, kv = jax.random.split(key, 3)
    query = jax.random.normal(kq, (B, T, H), dtype=jnp.float32)
    keys = jax.random.normal(kk, (B, S, H), dtype=jnp.float32)
    values = jax.random.normal(kv, (B, S, H), dtype=jnp.float32)

    # mask: all valid for batch 0, last two source positions masked for batch 1
    mask = jnp.ones((B, S), dtype=jnp.int32)
    mask = mask.at[1, S - 2:].set(0)

    # Path 1: values=None (keys used as values — single K DMA inside the kernel)
    o_attn, p_attn = discrete_attention(query, keys, values=None, mask=mask)
    jax.block_until_ready((o_attn, p_attn))
    o_ref, p_ref = _reference(query, keys, keys, mask)
    assert jnp.allclose(o_attn, o_ref, atol=1e-5, rtol=1e-5)
    assert jnp.allclose(p_attn, p_ref, atol=1e-5, rtol=1e-5)

    # Path 2: explicit values, no mask
    o2, p2 = discrete_attention(query, keys, values=values, mask=None)
    jax.block_until_ready((o2, p2))
    o2_ref, p2_ref = _reference(query, keys, values, None)
    assert jnp.allclose(o2, o2_ref, atol=1e-5, rtol=1e-5)
    assert jnp.allclose(p2, p2_ref, atol=1e-5, rtol=1e-5)

    print("KERNEL_OK")
</pallas_src>

<mosaic_0001>
module attributes {stable_mosaic.version = 11 : i64} {
  func.func @_attn_kernel(%arg0: i32, %arg1: i32, %arg2: memref<2x8x32xf32, #tpu.memory_space<vmem>>, %arg3: memref<2x8x32xf32, #tpu.memory_space<vmem>>, %arg4: memref<2x1x8xi32, #tpu.memory_space<vmem>>, %arg5: memref<2x8x32xf32, #tpu.memory_space<vmem>>, %arg6: memref<2x8x8xf32, #tpu.memory_space<vmem>>) attributes {dimension_semantics = [#tpu.dimension_semantics<parallel>, #tpu.dimension_semantics<parallel>], iteration_bounds = array<i64: 1, 1>, scalar_prefetch = 0 : i64, scratch_operands = 0 : i64, tpu.core_type = #tpu.core_type<tc>, window_params = [{transform_indices = @transform_0, window_bounds = array<i64: 2, 8, 32>}, {transform_indices = @transform_1, window_bounds = array<i64: 2, 8, 32>}, {transform_indices = @transform_2, window_bounds = array<i64: 2, 1, 8>}, {transform_indices = @transform_3, window_bounds = array<i64: 2, 8, 32>}, {transform_indices = @transform_4, window_bounds = array<i64: 2, 8, 8>}]} {
    %c0 = arith.constant 0 : index
    %c0_0 = arith.constant 0 : index
    %c0_1 = arith.constant 0 : index
    %0 = vector.load %arg2[%c0, %c0_0, %c0_1] : memref<2x8x32xf32, #tpu.memory_space<vmem>>, vector<2x8x32xf32>
    %cst = arith.constant 0.176776692 : f32
    %1 = vector.broadcast %cst : f32 to vector<2x8x32xf32>
    %2 = arith.mulf %0, %1 : vector<2x8x32xf32>
    %c0_2 = arith.constant 0 : index
    %c0_3 = arith.constant 0 : index
    %c0_4 = arith.constant 0 : index
    %3 = vector.load %arg3[%c0_2, %c0_3, %c0_4] : memref<2x8x32xf32, #tpu.memory_space<vmem>>, vector<2x8x32xf32>
    "tpu.trace_start"() <{level = 10 : i32, message = "bth,bsh->bts"}> : () -> ()
    %cst_5 = arith.constant dense<0.000000e+00> : vector<2x8x8xf32>
    %4 = tpu.matmul %2, %3, %cst_5 {dimension_numbers = #tpu.dot_dimension_numbers<[2], [2], [1], [1], [0, 0, 0, 1, 1, 1], [0], [0]>} : vector<2x8x32xf32>, vector<2x8x32xf32>, vector<2x8x8xf32> -> vector<2x8x8xf32>
    "tpu.trace_stop"() : () -> ()
    %c0_6 = arith.constant 0 : index
    %c0_7 = arith.constant 0 : index
    %c0_8 = arith.constant 0 : index
    %5 = vector.load %arg4[%c0_6, %c0_7, %c0_8] : memref<2x1x8xi32, #tpu.memory_space<vmem>>, vector<2x1x8xi32>
    %c0_i32 = arith.constant 0 : i32
    %6 = vector.broadcast %c0_i32 : i32 to vector<2x1x8xi32>
    %7 = arith.cmpi eq, %5, %6 : vector<2x1x8xi32>
    %cst_9 = arith.constant 0xFF800000 : f32
    %8 = vector.shape_cast %7 : vector<2x1x8xi1> to vector<2x1x8xi1>
    %9 = vector.broadcast %8 : vector<2x1x8xi1> to vector<2x8x8xi1>
    %10 = vector.broadcast %cst_9 : f32 to vector<2x8x8xf32>
    %11 = arith.select %9, %10, %4 : vector<2x8x8xi1>, vector<2x8x8xf32>
    %cst_10 = arith.constant dense<0xFF800000> : vector<2x8xf32>
    %12 = vector.multi_reduction <maximumf>, %11, %cst_10 [2] : vector<2x8x8xf32> to vector<2x8xf32>
    %13 = vector.shape_cast %12 : vector<2x8xf32> to vector<2x8x1xf32>
    %14 = vector.broadcast %13 : vector<2x8x1xf32> to vector<2x8x8xf32>
    %15 = arith.subf %11, %14 : vector<2x8x8xf32>
    %16 = math.exp %15 : vector<2x8x8xf32>
    %cst_11 = arith.constant dense<0.000000e+00> : vector<2x8xf32>
    %17 = vector.multi_reduction <add>, %16, %cst_11 [2] : vector<2x8x8xf32> to vector<2x8xf32>
    %18 = vector.shape_cast %17 : vector<2x8xf32> to vector<2x8x1xf32>
    %19 = tpu.reciprocal %18 : vector<2x8x1xf32> -> vector<2x8x1xf32>
    %20 = vector.broadcast %19 : vector<2x8x1xf32> to vector<2x8x8xf32>
    %21 = arith.mulf %16, %20 : vector<2x8x8xf32>
    %c0_12 = arith.constant 0 : index
    %c0_13 = arith.constant 0 : index
    %c0_14 = arith.constant 0 : index
    %22 = vector.load %arg3[%c0_12, %c0_13, %c0_14] : memref<2x8x32xf32, #tpu.memory_space<vmem>>, vector<2x8x32xf32>
    "tpu.trace_start"() <{level = 10 : i32, message = "bts,bsh->bth"}> : () -> ()
    %cst_15 = arith.constant dense<0.000000e+00> : vector<2x8x32xf32>
    %23 = tpu.matmul %21, %22, %cst_15 {dimension_numbers = #tpu.dot_dimension_numbers<[2], [1], [1], [2], [0, 0, 0, 1, 1, 2], [0], [0]>} : vector<2x8x8xf32>, vector<2x8x32xf32>, vector<2x8x32xf32> -> vector<2x8x32xf32>
    "tpu.trace_stop"() : () -> ()
    %c0_16 = arith.constant 0 : index
    %c0_17 = arith.constant 0 : index
    %c0_18 = arith.constant 0 : index
    %24 = vector.load %arg5[%c0_16, %c0_17, %c0_18] : memref<2x8x32xf32, #tpu.memory_space<vmem>>, vector<2x8x32xf32>
    tpu.vector_store %arg5[%c0_16, %c0_17, %c0_18], %23 {strides = array<i32>} : memref<2x8x32xf32, #tpu.memory_space<vmem>>, vector<2x8x32xf32>,
    %c0_19 = arith.constant 0 : index
    %c0_20 = arith.constant 0 : index
    %c0_21 = arith.constant 0 : index
    %25 = vector.load %arg6[%c0_19, %c0_20, %c0_21] : memref<2x8x8xf32, #tpu.memory_space<vmem>>, vector<2x8x8xf32>
    tpu.vector_store %arg6[%c0_19, %c0_20, %c0_21], %21 {strides = array<i32>} : memref<2x8x8xf32, #tpu.memory_space<vmem>>, vector<2x8x8xf32>,
    return
  }
  func.func @transform_0(%arg0: i32, %arg1: i32) -> (i32, i32, i32) {
    %c0_i32 = arith.constant 0 : i32
    %c0_i32_0 = arith.constant 0 : i32
    return %arg0, %arg1, %c0_i32 : i32, i32, i32
  }
  func.func @transform_1(%arg0: i32, %arg1: i32) -> (i32, i32, i32) {
    %c0_i32 = arith.constant 0 : i32
    %c0_i32_0 = arith.constant 0 : i32
    %c0_i32_1 = arith.constant 0 : i32
    return %arg0, %c0_i32, %c0_i32_0 : i32, i32, i32
  }
  func.func @transform_2(%arg0: i32, %arg1: i32) -> (i32, i32, i32) {
    %c0_i32 = arith.constant 0 : i32
    %c0_i32_0 = arith.constant 0 : i32
    %c0_i32_1 = arith.constant 0 : i32
    return %arg0, %c0_i32, %c0_i32_0 : i32, i32, i32
  }
  func.func @transform_3(%arg0: i32, %arg1: i32) -> (i32, i32, i32) {
    %c0_i32 = arith.constant 0 : i32
    %c0_i32_0 = arith.constant 0 : i32
    return %arg0, %arg1, %c0_i32 : i32, i32, i32
  }
  func.func @transform_4(%arg0: i32, %arg1: i32) -> (i32, i32, i32) {
    %c0_i32 = arith.constant 0 : i32
    %c0_i32_0 = arith.constant 0 : i32
    return %arg0, %arg1, %c0_i32 : i32, i32, i32
  }
}

</mosaic_0001>

<bundles_post_ra>
// kernel: tpu_custom_call.1
= control target key start
LH: loop header
LB: loop body
LE: loop exit
PB: predicated region body
PF: predicated region fallthrough
CT: control target
= control target key end

     0   :  { %10 = vsyncpa [#allocation3], 0  ;;  %s697_s0 = inlined_call_operand.hbm [shape: f32[2,8,32], index: 0, kind: input, shape index: {}]   ;;  %s698_s1 = inlined_call_operand.hbm [shape: f32[2,8,32], index: 1, kind: input, shape index: {}]   ;;  %s699_s2 = inlined_call_operand.vmem [shape: s32[2,1,8], index: 2, kind: input, shape index: {}]   ;;  %s700_s3 = inlined_call_operand.hbm [shape: f32[2,8,32], index: 3, kind: output, shape index: {0}]   ;;  %s701_s4 = inlined_call_operand.hbm [shape: f32[2,8,8], index: 4, kind: output, shape index: {1}]  }
   0x1   :  { %11 = vsyncpa [#allocation6], 0 }
   0x2   :  { %12 = vsyncpa [#allocation4], 0 }
   0x3   :  { %13 = vsyncpa [#allocation9], 0  ;;  %s579_s15 = smov [#allocation2]   ;;  %s483_s19 = scalar_lea.hbm %s697_s0, 256 }
   0x4   :  { %s19_s16 = sshll.u32 %s579_s15, 4  ;;  %p484_p0 = scmp.ne.s32.totalorder %s697_s0, %s483_s19  ;;  %s20_s16 = int_to_ptr.vmem [resolvable:$true] %s19_s16 }
   0x5   :  { %p487_p1 = scmp.lt.u32.totalorder %s483_s19, %s697_s0 }
   0x7   :  { %p489_p2 = pnand %p487_p1, %p484_p0 }
   0x9   :  { %492 = shalt.err (!%p489_p2)
}
   0xa   :  { %s493_s24 = scalar_lea.vmem %s20_s16, 256  ;;  %p498_p4 = scmp.lt.s32.totalorder %s20_s16, %s20_s16 }
   0xb   :  { %p494_p3 = scmp.ne.s32.totalorder %s20_s16, %s493_s24  ;;  %p499_p5 = scmp.lt.s32.totalorder %s493_s24, %s493_s24 }
   0xd   :  { %p500_p6 = por %p499_p5, %p498_p4 }
   0xf   :  { %p501_p7 = pnand %p500_p6, %p494_p3 }
  0x11   :  { %504 = shalt.err (!%p501_p7)
}
  0x12   :  { %s580_s25 = smov 128   ;;  %s581_s26 = smov 8  }
  0x13   :  { %25 = dma.hbm_to_vmem [thread:$0]  %s697_s0, 256, %s20_s16, [#allocation3], %s580_s25, %s580_s25, %s581_s26  }
  0x14   :  { %s582_s29 = smov [#allocation5]   ;;  %s505_s7 = scalar_lea.hbm %s698_s1, 256 }
  0x15   :  { %s31_s30 = sshll.u32 %s582_s29, 4  ;;  %p506_p8 = scmp.ne.s32.totalorder %s698_s1, %s505_s7  ;;  %s32_s30 = int_to_ptr.vmem [resolvable:$true] %s31_s30 }
  0x16   :  { %p509_p9 = scmp.lt.u32.totalorder %s505_s7, %s698_s1 }
  0x18   :  { %p511_p10 = pnand %p509_p9, %p506_p8 }
  0x1a   :  { %514 = shalt.err (!%p511_p10)
}
  0x1b   :  { %s515_s12 = scalar_lea.vmem %s32_s30, 256  ;;  %p520_p12 = scmp.lt.s32.totalorder %s32_s30, %s32_s30 }
  0x1c   :  { %p516_p11 = scmp.ne.s32.totalorder %s32_s30, %s515_s12  ;;  %p521_p13 = scmp.lt.s32.totalorder %s515_s12, %s515_s12 }
  0x1e   :  { %p522_p0 = por %p521_p13, %p520_p12 }
  0x20   :  { %p523_p1 = pnand %p522_p0, %p516_p11 }
  0x22   :  { %526 = shalt.err (!%p523_p1)
}
  0x23   :  { %37 = dma.hbm_to_vmem [thread:$0]  %s698_s1, 256, %s32_s30, [#allocation6], %s580_s25, %s580_s25, %s581_s26  }
  0x24   :  { %571 = dma.done.wait [#allocation3], 256  }
  0x25   :  { %572 = vsyncadd [#allocation3], 4294967040 }
  0x26   :  { %573 = dma.done.wait [#allocation6], 256  }
  0x27   :  { %574 = vsyncadd [#allocation6], 4294967040  ;;  %v583_v0 = vmov 0.0   ;;  %vm584_vm0 = vmmov 0   ;;  %vm52_vm1 = vcmask 261120   ;;  %v50_v1 = vld [vmem:[#allocation5] sm:$0xff]  ;;  %v211_v7 = vlaneseq }
  0x28   :  { %446 = vmatprep.subr.mxu0 %v583_v0  ;;  %448 = vmatprep.mubr.msk.f32.mxu0 %vm584_vm0, %v583_v0  ;;  %v46_v2 = vld [vmem:[#allocation2] sm:$0xff]  ;;  %v51_v3 = vld [vmem:[#allocation5 + $0x8] sm:$0xff]  ;;  %v47_v5 = vld [vmem:[#allocation2 + $0x8] sm:$0xff]  ;;  %v585_v12 = vmov 0   ;;  %vm223_vm6 = vcmask 64512  }
  0x29   :  { %451 = vmatprep.subr.mxu1 %v583_v0  ;;  %453 = vmatprep.mubr.msk.f32.mxu1 %vm584_vm0, %v583_v0  ;;  %v48_v4 = vmul.f32 0.17677669, %v46_v2  ;;  %v49_v6 = vmul.f32 0.17677669, %v47_v5  ;;  %v205_v8 = vld [vmem:[%s699_s2] sm:$0x1] }
  0x2a   :  { %447 = vmatpush3.xpose.msk.msra.mxu0 %vm52_vm1, %v50_v1  ;;  %452 = vmatpush3.xpose.msk.msra.mxu1 %vm52_vm1, %v51_v3  ;;  %v206_v9 = vld [vmem:[%s699_s2 + $0x1] sm:$0x1]  ;;  %v212_v10 = vshrl.u32 %v211_v7, 7  ;;  %vm207_vm2 = vcmp.eq.s32.totalorder %v205_v8, 0  ;;  %s586_s2 = smov [#allocation8]  }
  0x2b   :  { %456 = vmatprep.subr.mxu0 %v583_v0  ;;  %461 = vmatprep.subr.mxu1 %v583_v0  ;;  %vm208_vm3 = vcmp.eq.s32.totalorder %v206_v9, 0  ;;  %v209_v13 = vsel %vm207_vm2, 1, %v585_v12  ;;  %s415_s17 = sshll.u32 %s586_s2, 4  ;;  %s416_s17 = int_to_ptr.vmem [resolvable:$true] %s415_s17 }
  0x2c   :  { %v213_v11 = vsub.s32 0, %v212_v10  ;;  %v210_v14 = vsel %vm208_vm3, 1, %v585_v12  ;;  %s527_s18 = scalar_lea.vmem %s416_s17, 256  ;;  %p532_p3 = scmp.lt.s32.totalorder %s416_s17, %s416_s17 }
  0x2d   :  { %449 = vmatmul.mubr.msk.f32.vlgmr.msra.gmra.mrb[0].mxu0 %vm52_vm1, %v48_v4  ;;  %454 = vmatmul.mubr.msk.f32.vlgmr.msra.gmra.mrb[0].mxu1 %vm52_vm1, %v49_v6  ;;  %p528_p2 = scmp.ne.s32.totalorder %s416_s17, %s527_s18  ;;  %p533_p4 = scmp.lt.s32.totalorder %s527_s18, %s527_s18 }
  0x2e   :  { %457 = vmatpush3.msra.mxu0 %v50_v1  ;;  %458 = vmatprep.mubr.msk.f32.mxu0 %vm584_vm0, %v583_v0  ;;  %v214_v15 = vrot.slane %v209_v13, %v213_v11  ;;  %v218_v16 = vrot.slane %v210_v14, %v213_v11 }
  0x2f   :  { %462 = vmatpush3.msra.mxu1 %v51_v3  ;;  %463 = vmatprep.mubr.msk.f32.mxu1 %vm584_vm0, %v583_v0  ;;  %p534_p5 = por %p533_p4, %p532_p3 }
  0x30   :  { %vm219_vm4 = vcmp.eq.s32.totalorder %v214_v15, 1  ;;  %vm220_vm5 = vcmp.eq.s32.totalorder %v218_v16, 1 }
  0x31   :  { %p535_p6 = pnand %p534_p5, %p528_p2 }
 0x100   :  { %v125_v17 = vpop.f32.mrb[0].mxu0  ;;  %v201_v18 = vpop.f32.mrb[0].mxu1 }
 0x101   :  { %v221_v19 = vsel %vm219_vm4, -inf, %v125_v17  ;;  %v450_v20 = vpop.f32.mrb[1].mxu0  ;;  %v222_v21 = vsel %vm220_vm5, -inf, %v201_v18  ;;  %v455_v22 = vpop.f32.mrb[1].mxu1 }
 0x102   :  { %v224_v23 = vsel %vm223_vm6, %v221_v19, -inf  ;;  %v227_v24 = vsel %vm223_vm6, %v222_v21, -inf }
 0x103   :  { %225 = vmax.xlane.f32.xlu0 %v224_v23 }
 0x107   :  { %228 = vmax.xlane.f32.xlu0 %v227_v24 }
 0x190   :  { %v226_v25 = vpop.xlane.xlu0 %225 }
 0x191   :  { %v230_v26 = vsub.f32 %v221_v19, %v226_v25 }
 0x193   :  { %v232_v27 = vmul.f32 1.442695, %v230_v26 }
 0x194   :  { %v229_v28 = vpop.xlane.xlu0 %228 }
 0x195   :  { %475 = vpow2.f32 %v232_v27  ;;  %v231_v29 = vsub.f32 %v222_v21, %v229_v28 }
 0x197   :  { %v234_v30 = vmul.f32 1.442695, %v231_v29 }
 0x199   :  { %477 = vpow2.f32 %v234_v30 }
 0x19f   :  { %v476_v31 = vpop.eup %475 }
 0x1a0   :  { %v236_v32 = vsel %vm223_vm6, %v476_v31, 0.0 }
 0x1a1   :  { %237 = vadd.xlane.f32.xlu1 %v236_v32 }
 0x1a3   :  { %v478_v33 = vpop.eup %477 }
 0x1a4   :  { %v239_v34 = vsel %vm223_vm6, %v478_v33, 0.0 }
 0x1a5   :  { %240 = vadd.xlane.f32.xlu1 %v239_v34 }
 0x22e   :  { %v238_v35 = vpop.xlane.xlu1 %237 }
 0x22f   :  { %479 = vrcp.f32 %v238_v35 }
 0x232   :  { %v241_v36 = vpop.xlane.xlu1 %240 }
 0x233   :  { %481 = vrcp.f32 %v241_v36 }
 0x239   :  { %v480_v37 = vpop.eup %479 }
 0x23a   :  { %v244_v38 = vmul.f32 %v480_v37, %v476_v31 }
 0x23c   :  { %396 = vst.msk [vmem:[#allocation8] sm:$0xff] %vm223_vm6, %v244_v38  ;;  %459 = vmatmul.mubr.msk.f32.vlgmr.msra.gmra.mrb[2].mxu0 %vm223_vm6, %v244_v38 }
 0x23d   :  { %v482_v39 = vpop.eup %481 }
 0x23e   :  { %v245_v40 = vmul.f32 %v482_v39, %v478_v33 }
 0x240   :  { %397 = vst.msk [vmem:[#allocation8 + $0x8] sm:$0xff] %vm223_vm6, %v245_v40  ;;  %464 = vmatmul.mubr.msk.f32.vlgmr.msra.gmra.mrb[2].mxu1 %vm223_vm6, %v245_v40 }
 0x241   :  { %538 = shalt.err (!%p535_p6)
}
 0x242   :  { %s539_s21 = scalar_lea.hbm %s701_s4, 256 }
 0x243   :  { %p540_p7 = scmp.ne.s32.totalorder %s701_s4, %s539_s21  ;;  %p543_p8 = scmp.lt.u32.totalorder %s539_s21, %s701_s4 }
 0x245   :  { %p545_p9 = pnand %p543_p8, %p540_p7 }
 0x247   :  { %548 = shalt.err (!%p545_p9)
}
 0x248   :  { %421 = dma.vmem_to_hbm [thread:$0]  %s416_s17, 256, %s701_s4, [#allocation9], %s580_s25, %s580_s25, %s581_s26  }
 0x249   :  { %s587_s30 = smov [#allocation7]  }
 0x24a   :  { %s403_s5 = sshll.u32 %s587_s30, 4  ;;  %s404_s5 = int_to_ptr.vmem [resolvable:$true] %s403_s5 }
 0x24b   :  { %s549_s6 = scalar_lea.vmem %s404_s5, 256  ;;  %p554_p11 = scmp.lt.s32.totalorder %s404_s5, %s404_s5 }
 0x24c   :  { %p550_p10 = scmp.ne.s32.totalorder %s404_s5, %s549_s6  ;;  %p555_p12 = scmp.lt.s32.totalorder %s549_s6, %s549_s6 }
 0x24e   :  { %p556_p13 = por %p555_p12, %p554_p11 }
 0x250   :  { %p557_p0 = pnand %p556_p13, %p550_p10 }
 0x30f   :  { %v317_v41 = vpop.f32.mrb[2].mxu0 }
 0x310   :  { %394 = vst.msk [vmem:[#allocation7] sm:$0xff] %vm52_vm1, %v317_v41  ;;  %v460_v42 = vpop.f32.mrb[3].mxu0 }
 0x313   :  { %v390_v43 = vpop.f32.mrb[2].mxu1 }
 0x314   :  { %395 = vst.msk [vmem:[#allocation7 + $0x8] sm:$0xff] %vm52_vm1, %v390_v43  ;;  %v465_v44 = vpop.f32.mrb[3].mxu1 }
 0x315   :  { %560 = shalt.err (!%p557_p0)
}
 0x316   :  { %s561_s8 = scalar_lea.hbm %s700_s3, 256 }
 0x317   :  { %p562_p1 = scmp.ne.s32.totalorder %s700_s3, %s561_s8  ;;  %p565_p2 = scmp.lt.u32.totalorder %s561_s8, %s700_s3 }
 0x319   :  { %p567_p3 = pnand %p565_p2, %p562_p1 }
 0x31b   :  { %570 = shalt.err (!%p567_p3)
}
 0x31c   :  { %409 = dma.vmem_to_hbm [thread:$0]  %s404_s5, 256, %s700_s3, [#allocation4], %s580_s25, %s580_s25, %s581_s26  }
 0x31d   :  { %575 = dma.done.wait [#allocation4], 256  }
 0x31e   :  { %576 = vsyncadd [#allocation4], 4294967040 }
 0x31f   :  { %577 = dma.done.wait [#allocation9], 256  }
 0x320   :  { %578 = vsyncadd [#allocation9], 4294967040 }
 0x321   :  { %428 = vsyncpa [#allocation3], 1 }
 0x322   :  { %429 = vsyncpa [#allocation6], 1 }
 0x323   :  { %430 = vsyncpa [#allocation4], 1 }
 0x324   :  { %431 = vsyncpa [#allocation9], 1 }

</bundles_post_ra>
